<compile_context>
chip_gen: v7x
topology: tpu7x:2x2x1
jax: 0.10.0
libtpu: 0.0.40
codegen_flags: <defaults>
</compile_context>

<pallas_src>
import jax
import jax.numpy as jnp
from jax.experimental import pallas as pl
from jax.experimental.pallas import tpu as pltpu


def _ca_kernel(x_ref, w1t_ref, b1_ref, w2t_ref, b2_ref, o_ref):
    """One grid step: a block of Nb full images.

    x_ref : (Nb, C, HW)  input block (full spatial extent per image)
    w1t   : (C, Cr)      first 1x1 conv weight, pre-transposed
    b1    : (1, Cr)
    w2t   : (Cr, C)      second 1x1 conv weight, pre-transposed
    b2    : (1, C)
    o_ref : (Nb, C, HW)
    """
    x = x_ref[...]                                              # (Nb, C, HW)
    hw = x.shape[-1]                                            # Python int
    # Global average pool: lane-axis sum (XLU) * static reciprocal.
    mean = jnp.sum(x.astype(jnp.float32), axis=-1) * (1.0 / hw)  # (Nb, C)
    # 1x1 conv #1 (C -> Cr) + ReLU, batch on the leading axis.
    y1 = jnp.dot(mean, w1t_ref[...], preferred_element_type=jnp.float32)
    y1 = jnp.maximum(y1 + b1_ref[...], 0.0)                      # (Nb, Cr)
    # 1x1 conv #2 (Cr -> C) + Sigmoid (EUP).
    y2 = jnp.dot(y1, w2t_ref[...], preferred_element_type=jnp.float32)
    y2 = jax.nn.sigmoid(y2 + b2_ref[...])                        # (Nb, C)
    # Channel-wise rescale broadcast over HW — the streaming multiply + store
    # of the x block is the HBM-bound part of this kernel.
    o_ref[...] = (x * y2[:, :, None]).astype(o_ref.dtype)


def _pick_images_per_block(n, per_image_bytes, target_bytes):
    """Largest divisor of n whose block fits the byte target, preferring to
    keep >= 2 grid steps so both v7x TensorCores get parallel work."""
    best = 1
    for d in range(1, n + 1):
        if n % d:
            continue
        if d * per_image_bytes > target_bytes:
            break
        if n // d >= 2 or n == 1:
            best = d
    return best


def ca_layer(x_nchw, w1, b1, w2, b2, *, target_block_bytes=4 << 20):
    """Channel attention.

    x_nchw: (N, C, H, W). w1: (C//r, C), b1: (C//r, 1) or (C//r,),
    w2: (C, C//r), b2: (C, 1) or (C,).
    """
    N, C, H, W = x_nchw.shape
    HW = H * W
    Cr = w1.shape[0]
    dtype = x_nchw.dtype

    x_flat = x_nchw.reshape(N, C, HW)               # free row-major view
    # Pre-transpose the 1x1-conv weights once outside the kernel so the
    # in-kernel contractions are (Nb,C)@(C,Cr) and (Nb,Cr)@(Cr,C).
    w1t = jnp.asarray(w1, jnp.float32).T            # (C, Cr)
    w2t = jnp.asarray(w2, jnp.float32).T            # (Cr, C)
    b1r = jnp.asarray(b1, jnp.float32).reshape(1, Cr)
    b2r = jnp.asarray(b2, jnp.float32).reshape(1, C)

    per_image_bytes = C * HW * x_flat.dtype.itemsize
    nb = _pick_images_per_block(N, per_image_bytes, target_block_bytes)
    grid = (N // nb,)
    block_bytes = nb * per_image_bytes

    # in + out blocks, double-buffered, plus params and slack; cap below
    # v7x's 64 MiB physical VMEM.
    param_bytes = 4 * (w1t.size + w2t.size + b1r.size + b2r.size)
    vmem_needed = 4 * block_bytes + param_bytes + (2 << 20)
    vmem_limit = int(min(48 << 20, max(16 << 20, vmem_needed)))

    out = pl.pallas_call(
        _ca_kernel,
        out_shape=jax.ShapeDtypeStruct((N, C, HW), dtype),
        grid_spec=pltpu.PrefetchScalarGridSpec(
            num_scalar_prefetch=0,
            grid=grid,
            in_specs=[
                pl.BlockSpec((nb, C, HW), lambda i: (i, 0, 0)),  # x block
                pl.BlockSpec((C, Cr), lambda i: (0, 0)),          # w1^T
                pl.BlockSpec((1, Cr), lambda i: (0, 0)),          # b1
                pl.BlockSpec((Cr, C), lambda i: (0, 0)),          # w2^T
                pl.BlockSpec((1, C), lambda i: (0, 0)),           # b2
            ],
            out_specs=pl.BlockSpec((nb, C, HW), lambda i: (i, 0, 0)),
        ),
        compiler_params=pltpu.CompilerParams(
            dimension_semantics=("parallel",),
            vmem_limit_bytes=vmem_limit,
        ),
    )(x_flat, w1t, b1r, w2t, b2r)

    return out.reshape(N, C, H, W)


def ca_layer_ref(x, w1, b1, w2, b2):
    """Plain-JAX reference matching the PyTorch module."""
    y = jnp.mean(x, axis=(2, 3), keepdims=True)                     # (N,C,1,1)
    y = jnp.einsum('oc,ncij->noij', w1, y) + b1[None, :, :, None]   # (N,Cr,1,1)
    y = jnp.maximum(y, 0.0)
    y = jnp.einsum('oc,ncij->noij', w2, y) + b2[None, :, :, None]   # (N,C,1,1)
    y = jax.nn.sigmoid(y)
    return x * y


if __name__ == "__main__":
    # Small shapes consistent with the module: channel=64, reduction=16.
    N, C, H, W = 2, 64, 8, 8
    reduction = 16
    Cr = C // reduction

    key = jax.random.PRNGKey(0)
    kx, k1, kb1, k2, kb2 = jax.random.split(key, 5)

    x = jax.random.normal(kx, (N, C, H, W), dtype=jnp.float32)
    # Deterministic synthetic parameters (1x1 convs == dense layers on channels).
    w1 = jax.random.normal(k1, (Cr, C), dtype=jnp.float32) * 0.1
    b1 = jax.random.normal(kb1, (Cr, 1), dtype=jnp.float32) * 0.1
    w2 = jax.random.normal(k2, (C, Cr), dtype=jnp.float32) * 0.1
    b2 = jax.random.normal(kb2, (C, 1), dtype=jnp.float32) * 0.1

    out = ca_layer(x, w1, b1, w2, b2)
    out = jax.block_until_ready(out)

    ref = ca_layer_ref(x, w1, b1, w2, b2)
    assert out.shape == (N, C, H, W)
    assert jnp.allclose(out, ref, atol=1e-5, rtol=1e-5)

    print("KERNEL_OK")
</pallas_src>

<mosaic_0001>
module attributes {stable_mosaic.version = 11 : i64} {
  func.func @_ca_kernel(%arg0: i32, %arg1: memref<1x64x64xf32, #tpu.memory_space<vmem>>, %arg2: memref<64x4xf32, #tpu.memory_space<vmem>>, %arg3: memref<1x4xf32, #tpu.memory_space<vmem>>, %arg4: memref<4x64xf32, #tpu.memory_space<vmem>>, %arg5: memref<1x64xf32, #tpu.memory_space<vmem>>, %arg6: memref<1x64x64xf32, #tpu.memory_space<vmem>>) attributes {dimension_semantics = [#tpu.dimension_semantics<parallel>], iteration_bounds = array<i64: 2>, scalar_prefetch = 0 : i64, scratch_operands = 0 : i64, tpu.core_type = #tpu.core_type<tc>, window_params = [{transform_indices = @transform_0, window_bounds = array<i64: 1, 64, 64>}, {pipeline_mode = #tpu.pipeline_mode<synchronous>, transform_indices = @transform_1, window_bounds = array<i64: 64, 4>}, {pipeline_mode = #tpu.pipeline_mode<synchronous>, transform_indices = @transform_2, window_bounds = array<i64: 1, 4>}, {pipeline_mode = #tpu.pipeline_mode<synchronous>, transform_indices = @transform_3, window_bounds = array<i64: 4, 64>}, {pipeline_mode = #tpu.pipeline_mode<synchronous>, transform_indices = @transform_4, window_bounds = array<i64: 1, 64>}, {transform_indices = @transform_5, window_bounds = array<i64: 1, 64, 64>}]} {
    %c0 = arith.constant 0 : index
    %c0_0 = arith.constant 0 : index
    %c0_1 = arith.constant 0 : index
    %0 = vector.load %arg1[%c0, %c0_0, %c0_1] : memref<1x64x64xf32, #tpu.memory_space<vmem>>, vector<1x64x64xf32>
    %cst = arith.constant dense<0.000000e+00> : vector<1x64xf32>
    %1 = vector.multi_reduction <add>, %0, %cst [2] : vector<1x64x64xf32> to vector<1x64xf32>
    %cst_2 = arith.constant 1.562500e-02 : f32
    %2 = vector.broadcast %cst_2 : f32 to vector<1x64xf32>
    %3 = arith.mulf %1, %2 : vector<1x64xf32>
    %c0_3 = arith.constant 0 : index
    %c0_4 = arith.constant 0 : index
    %4 = vector.load %arg2[%c0_3, %c0_4] : memref<64x4xf32, #tpu.memory_space<vmem>>, vector<64x4xf32>
    %cst_5 = arith.constant dense<0.000000e+00> : vector<1x4xf32>
    %5 = tpu.matmul %3, %4, %cst_5 {dimension_numbers = #tpu.dot_dimension_numbers<[1], [0], [0], [1], [0, 0, 1, 1], [], []>} : vector<1x64xf32>, vector<64x4xf32>, vector<1x4xf32> -> vector<1x4xf32>
    %c0_6 = arith.constant 0 : index
    %c0_7 = arith.constant 0 : index
    %6 = vector.load %arg3[%c0_6, %c0_7] : memref<1x4xf32, #tpu.memory_space<vmem>>, vector<1x4xf32>
    %7 = arith.addf %5, %6 : vector<1x4xf32>
    %cst_8 = arith.constant 0.000000e+00 : f32
    %8 = vector.broadcast %cst_8 : f32 to vector<1x4xf32>
    %9 = arith.maximumf %7, %8 : vector<1x4xf32>
    %c0_9 = arith.constant 0 : index
    %c0_10 = arith.constant 0 : index
    %10 = vector.load %arg4[%c0_9, %c0_10] : memref<4x64xf32, #tpu.memory_space<vmem>>, vector<4x64xf32>
    %cst_11 = arith.constant dense<0.000000e+00> : vector<1x64xf32>
    %11 = tpu.matmul %9, %10, %cst_11 {dimension_numbers = #tpu.dot_dimension_numbers<[1], [0], [0], [1], [0, 0, 1, 1], [], []>} : vector<1x4xf32>, vector<4x64xf32>, vector<1x64xf32> -> vector<1x64xf32>
    %c0_12 = arith.constant 0 : index
    %c0_13 = arith.constant 0 : index
    %12 = vector.load %arg5[%c0_12, %c0_13] : memref<1x64xf32, #tpu.memory_space<vmem>>, vector<1x64xf32>
    %13 = arith.addf %11, %12 : vector<1x64xf32>
    %14 = arith.negf %13 : vector<1x64xf32>
    %15 = math.exp %14 : vector<1x64xf32>
    %cst_14 = arith.constant 1.000000e+00 : f32
    %16 = vector.broadcast %cst_14 : f32 to vector<1x64xf32>
    %17 = arith.addf %16, %15 : vector<1x64xf32>
    %18 = arith.divf %16, %17 : vector<1x64xf32>
    %19 = vector.shape_cast %18 : vector<1x64xf32> to vector<1x64x1xf32>
    %20 = vector.broadcast %19 : vector<1x64x1xf32> to vector<1x64x64xf32>
    %21 = arith.mulf %0, %20 : vector<1x64x64xf32>
    %c0_15 = arith.constant 0 : index
    %c0_16 = arith.constant 0 : index
    %c0_17 = arith.constant 0 : index
    %22 = vector.load %arg6[%c0_15, %c0_16, %c0_17] : memref<1x64x64xf32, #tpu.memory_space<vmem>>, vector<1x64x64xf32>
    tpu.vector_store %arg6[%c0_15, %c0_16, %c0_17], %21 {strides = array<i32>} : memref<1x64x64xf32, #tpu.memory_space<vmem>>, vector<1x64x64xf32>,
    return
  }
  func.func @transform_0(%arg0: i32) -> (i32, i32, i32) {
    %c0_i32 = arith.constant 0 : i32
    %c0_i32_0 = arith.constant 0 : i32
    %c0_i32_1 = arith.constant 0 : i32
    return %arg0, %c0_i32, %c0_i32_0 : i32, i32, i32
  }
  func.func @transform_1(%arg0: i32) -> (i32, i32) {
    %c0_i32 = arith.constant 0 : i32
    %c0_i32_0 = arith.constant 0 : i32
    %c0_i32_1 = arith.constant 0 : i32
    return %c0_i32, %c0_i32_0 : i32, i32
  }
  func.func @transform_2(%arg0: i32) -> (i32, i32) {
    %c0_i32 = arith.constant 0 : i32
    %c0_i32_0 = arith.constant 0 : i32
    %c0_i32_1 = arith.constant 0 : i32
    return %c0_i32, %c0_i32_0 : i32, i32
  }
  func.func @transform_3(%arg0: i32) -> (i32, i32) {
    %c0_i32 = arith.constant 0 : i32
    %c0_i32_0 = arith.constant 0 : i32
    %c0_i32_1 = arith.constant 0 : i32
    return %c0_i32, %c0_i32_0 : i32, i32
  }
  func.func @transform_4(%arg0: i32) -> (i32, i32) {
    %c0_i32 = arith.constant 0 : i32
    %c0_i32_0 = arith.constant 0 : i32
    %c0_i32_1 = arith.constant 0 : i32
    return %c0_i32, %c0_i32_0 : i32, i32
  }
  func.func @transform_5(%arg0: i32) -> (i32, i32, i32) {
    %c0_i32 = arith.constant 0 : i32
    %c0_i32_0 = arith.constant 0 : i32
    %c0_i32_1 = arith.constant 0 : i32
    return %arg0, %c0_i32, %c0_i32_0 : i32, i32, i32
  }
}

</mosaic_0001>

<bundles_post_ra>
// kernel: tpu_custom_call.1
= control target key start
LH: loop header
LB: loop body
LE: loop exit
PB: predicated region body
PF: predicated region fallthrough
CT: control target
= control target key end

     0   :  { %10 = vsyncpa [#allocation3], 0  ;;  %s1173_s0 = inlined_call_operand.hbm [shape: f32[2,64,64], index: 0, kind: input, shape index: {}]   ;;  %s1174_s1 = inlined_call_operand.vmem [shape: f32[64,4], index: 1, kind: input, shape index: {}]   ;;  %s1175_s2 = inlined_call_operand.vmem [shape: f32[1,4], index: 2, kind: input, shape index: {}]   ;;  %s1176_s3 = inlined_call_operand.vmem [shape: f32[4,64], index: 3, kind: input, shape index: {}]   ;;  %s1177_s4 = inlined_call_operand.vmem [shape: f32[1,64], index: 4, kind: input, shape index: {}]   ;;  %s1178_s5 = inlined_call_operand.hbm [shape: f32[2,64,64], index: 5, kind: output, shape index: {}]  }
   0x1   :  { %12 = vsyncpa [#allocation3 + $0x1], 0 }
   0x2   :  { %13 = vsyncpa [#allocation4], 0 }
   0x3   :  { %15 = vsyncpa [#allocation4 + $0x1], 0  ;;  %s914_s18 = smov 0   ;;  %s916_s19 = smov 0  }
   0x4   :  { %s918_s20 = smov 0   ;;  %s920_s21 = smov 0  }
   0x5 LB: > { %s935_s22 = sadd.s32 4294967295, %s873_s21   ;;  %s653_s23 = sadd.s32 4294967294, %s873_s21   ;;  %s873_s21 = sphi %s920_s21, %s1191_s21   ;;  %s869_s20 = sphi %s918_s20, %s1190_s20   ;;  %s865_s19 = sphi %s916_s19, %s1189_s19   ;;  %s861_s18 = sphi %s914_s18, %s1188_s18  }
   0x6   : > { %s939_s24 = sadd.s32 1, %s873_s21   ;;  %s28_s25 = sadd.s32 1, %s869_s20 }
   0x7   : > { %s25_s26 = ssub.s32 %s873_s21, %s939_s24  ;;  %p35_p0 = scmp.ne.s32.totalorder %s869_s20, %s865_s19 }
   0x8   : > { %p26_p1 = scmp.eq.s32.totalorder %s25_s26, 0  ;;  %p36_p2 = scmp.eq.s32.totalorder %s873_s21, 0 }
   0x9   : > { %p41_p3 = scmp.ne.s32.totalorder %s865_s19, %s861_s18  ;;  %p42_p4 = scmp.eq.s32.totalorder %s935_s22, 0 }
   0xa   : > { %s951_s27 = scalar_select %p26_p1, %s869_s20, %s28_s25  }
   0xb   : > { %p953_p5 = por %p36_p2, %p35_p0  ;;  %p957_p6 = por %p42_p4, %p41_p3 }
   0xc   : > { %p149_p7 = scmp.eq.s32.totalorder %s935_s22, 1  ;;  %p155_p8 = scmp.eq.s32.totalorder %s653_s23, 1 }
   0xd   : > { %p732_p10 = scmp.lt.s32.totalorder %s873_s21, 2  ;;  %s187_s7 = sand.u32 1, %s869_s20  }
   0xe   : > { %p964_p11 = por %p149_p7, %p35_p0  ;;  %p968_p12 = por %p155_p8, %p41_p3 }
   0xf   : > { %s671_s8 = sshll.u32 %s873_s21, 10  ;;  %s656_s9 = sshll.u32 %s187_s7, 6 }
  0x10   : > { %s1182_s30 = scalar_select %p964_p11, 1, 0 }
  0x11   : > { %s1183_s6 = scalar_select %p968_p12, 1, 0 }
  0x12   : > { %s977_s12 = scalar_lea.hbm %s1173_s0, %s671_s8  ;;  %s191_s13 = scalar_lea.vmem [#allocation2], %s656_s9 }
  0x13   : > { %s198_s14 = sshll.u32 %s191_s13, 4  ;;  %p981_p13 = pnand %p732_p10, %p953_p5  ;;  %s985_s14 = int_to_ptr.vmem [resolvable:$true] %s198_s14 }
  0x14   : > { %s987_s16 = scalar_lea.sflag [#allocation3], %s187_s7  ;;  %s777_s17 = scalar_lea.hbm %s977_s12, 1024 }
  0x15   : > { %p778_p0 = scmp.ne.s32.totalorder %s977_s12, %s777_s17  ;;  %p779_p1 = pneg %p981_p13 }
  0x16   : > { %s782_s26 = scalar_lea.hbm %s1173_s0, 2048  ;;  %p783_p4 = scmp.lt.u32.totalorder %s977_s12, %s1173_s0 }
  0x17   : > { %p780_p2 = pnand %p779_p1, %p778_p0  ;;  %p784_p5 = scmp.lt.u32.totalorder %s782_s26, %s777_s17 }
  0x18   : > { %p786_p8 = scmp.lt.u32.totalorder %s777_s17, %s977_s12 }
  0x19   : > { %p781_p3 = pneg %p780_p2  ;;  %p785_p7 = por %p784_p5, %p783_p4 }
  0x1b   : > { %p787_p10 = por %p786_p8, %p785_p7 }
  0x1d   : > { %p788_p9 = pnand %p787_p10, %p781_p3 }
  0x1f   : > { %791 = shalt.err (!%p788_p9)
}
  0x20   : > { %s792_s7 = scalar_lea.vmem %s985_s14, 1024  ;;  %s875_s9 = smov [#allocation2]  }
  0x21   : > { %p793_p0 = scmp.ne.s32.totalorder %s985_s14, %s792_s7  ;;  %s797_s10 = sshll.u32 %s875_s9, 4  ;;  %s798_s10 = int_to_ptr.vmem [resolvable:$false] %s797_s10 }
  0x22   : > { %s799_s11 = scalar_lea.vmem %s798_s10, 2048  ;;  %p800_p11 = scmp.lt.s32.totalorder %s985_s14, %s798_s10 }
  0x23   : > { %p795_p2 = pnand %p793_p0, %p779_p1  ;;  %p801_p4 = scmp.lt.s32.totalorder %s799_s11, %s792_s7 }
  0x25   : > { %p796_p12 = pneg %p795_p2  ;;  %p802_p5 = por %p801_p4, %p800_p11 }
  0x27   : > { %p803_p7 = pnand %p802_p5, %p796_p12 }
  0x29   : > { %806 = shalt.err (!%p803_p7)
}
  0x2a   : > { %s876_s13 = smov 128   ;;  %s877_s17 = smov 8  }
  0x2b   : > { %727 = dma.hbm_to_vmem [thread:$0]  (!%p981_p13), %s977_s12, 1024, %s985_s14, %s987_s16, %s876_s13, %s876_s13, %s877_s17  }
  0x2c   : > { %p659_p9 = scmp.ge.s32.totalorder %s873_s21, 1  ;;  %p206_p1 = scmp.lt.s32.totalorder %s873_s21, 3 }
  0x2e   : > { %p207_p3 = pnand %p659_p9, %p206_p1 }
  0x2f   : > { %s1018_s23 = sand.u32 (!%p207_p3), 1, %s865_s19  }
  0x30   : > { %210 = sbr.rel (%p207_p3) target bundleno = 824 (0x338), region = 40  ;;  %s660_s25 = sshll.u32 (!%p207_p3), %s1018_s23, 6 }
  0x31   : > { %s213_s26 = scalar_lea.sflag (!%p207_p3), [#allocation3], %s1018_s23  ;;  %s216_s28 = scalar_lea.vmem (!%p207_p3), [#allocation2], %s660_s25 }
  0x37   : > { %852 = dma.done.wait (%p957_p6), %s213_s26, 1024  }
  0x38   : > { %854 = vsyncadd (%p957_p6), %s213_s26, 4294966272  ;;  %vm251_vm0 = vcmask 523264   ;;  %v1028_v0 = vld [vmem:[%s216_s28] sm:$0xff]  ;;  %v1030_v1 = vld [vmem:[%s216_s28 + $0x10] sm:$0xff]  ;;  %v878_v19 = vmov 0.0|0.0   ;;  %vm879_vm1 = vmmov 0   ;;  %v301_v30 = vlaneseq }
  0x39   : > { %v1032_v2 = vld [vmem:[%s216_s28 + $0x8] sm:$0xff]  ;;  %v252_v3 = vsel %vm251_vm0, %v1028_v0, 0.0  ;;  %v258_v4 = vsel %vm251_vm0, %v1030_v1, 0.0  ;;  %v1038_v5 = vld [vmem:[%s216_s28 + $0x18] sm:$0xff]  ;;  %v1044_v8 = vld [vmem:[%s216_s28 + $0x20] sm:$0xff]  ;;  %708 = vmatprep.subr.bf16.mxu0 %v878_v19  ;;  %v880_v29 = vmov 0.0  }
  0x3a   : > { %253 = vadd.xlane.f32.xlu0 %v252_v3  ;;  %259 = vadd.xlane.f32.xlu1 %v258_v4  ;;  %v255_v6 = vsel %vm251_vm0, %v1032_v2, 0.0  ;;  %v261_v7 = vsel %vm251_vm0, %v1038_v5, 0.0  ;;  %v1046_v9 = vld [vmem:[%s216_s28 + $0x28] sm:$0xff]  ;;  %v264_v10 = vsel %vm251_vm0, %v1044_v8, 0.0  ;;  %v1052_v12 = vld [vmem:[%s216_s28 + $0x30] sm:$0xff]  ;;  %v1054_v13 = vld [vmem:[%s216_s28 + $0x38] sm:$0xff] }
  0x3b   : > { %v267_v11 = vsel %vm251_vm0, %v1046_v9, 0.0  ;;  %v270_v14 = vsel %vm251_vm0, %v1052_v12, 0.0  ;;  %v273_v15 = vsel %vm251_vm0, %v1054_v13, 0.0  ;;  %v284_v16 = vld [vmem:[%s1174_s1] sm:$0xff]  ;;  %v285_v17 = vld [vmem:[%s1174_s1 + $0x8] sm:$0xff]  ;;  %v286_v20 = vld [vmem:[%s1174_s1 + $0x10] sm:$0xff]  ;;  %700 = vmatprep.mubr.msk.f32.mxu0 %vm879_vm1, %v880_v29  ;;  %703 = vmatprep.subr.mxu1 %v880_v29 }
  0x3c   : > { %v709_v18 = vpack.c.bf16 %v285_v17, %v284_v16  ;;  %v287_v21 = vld [vmem:[%s1174_s1 + $0x18] sm:$0xff]  ;;  %v288_v23 = vld [vmem:[%s1174_s1 + $0x20] sm:$0xff]  ;;  %v289_v24 = vld [vmem:[%s1174_s1 + $0x28] sm:$0xff]  ;;  %705 = vmatprep.mubr.msk.f32.mxu1 %vm879_vm1, %v880_v29  ;;  %v302_v31 = vand.u32 127, %v301_v30  ;;  %v1084_v32 = vshrl.u32 %v301_v30, 7  ;;  %vm312_vm2 = vcmask 130112  }
  0x3d   : > { %v712_v22 = vpack.c.bf16 %v287_v21, %v286_v20  ;;  %v715_v25 = vpack.c.bf16 %v289_v24, %v288_v23  ;;  %v290_v26 = vld [vmem:[%s1174_s1 + $0x30] sm:$0xff]  ;;  %v291_v27 = vld [vmem:[%s1174_s1 + $0x38] sm:$0xff]  ;;  %vm319_vm3 = vcmask 195712   ;;  %vm326_vm4 = vcmask 261312   ;;  %v429_v23 = vld [vmem:[%s1176_s3] sm:$0xf] }
  0x3e   : > { %256 = vadd.xlane.f32.xlu0 %v255_v6  ;;  %262 = vadd.xlane.f32.xlu1 %v261_v7  ;;  %v718_v28 = vpack.c.bf16 %v291_v27, %v290_v26  ;;  %v307_v33 = vadd.s32 4294967288, %v302_v31  ;;  %v321_v34 = vadd.s32 4294967272, %v302_v31  ;;  %v314_v36 = vadd.s32 4294967280, %v302_v31  ;;  %v292_v24 = vld [vmem:[%s1175_s2] sm:$0x1]  ;;  %s242_s10 = scalar_lea.vmem [#allocation5], %s660_s25 }
  0x3f   : > { %710 = vmatpush3.bf16.msra.mxu0 %v709_v18  ;;  %v328_v38 = vadd.s32 4294967264, %v302_v31  ;;  %v305_v39 = vsub.s32 %v302_v31, %v1084_v32  ;;  %v335_v47 = vadd.s32 4294967256, %v302_v31  ;;  %v342_v51 = vadd.s32 4294967248, %v302_v31  ;;  %v430_v29 = vld [vmem:[%s1177_s4] sm:$0x1]  ;;  %s672_s25 = sshll.u32 %s935_s22, 10 }
  0x40   : > { %711 = vmatprep.subr.bf16.mxu0 %v878_v19  ;;  %v310_v41 = vsub.s32 %v307_v33, %v1084_v32  ;;  %v324_v42 = vsub.s32 %v321_v34, %v1084_v32  ;;  %v317_v43 = vsub.s32 %v314_v36, %v1084_v32  ;;  %v349_v55 = vadd.s32 4294967240, %v302_v31  ;;  %s580_s11 = sshll.u32 %s242_s10, 4  ;;  %s1125_s26 = scalar_lea.hbm %s1178_s5, %s672_s25  ;;  %s1127_s11 = int_to_ptr.vmem [resolvable:$true] %s580_s11 }
  0x41   : > { %v331_v50 = vsub.s32 %v328_v38, %v1084_v32  ;;  %v338_v58 = vsub.s32 %v335_v47, %v1084_v32  ;;  %vm333_vm5 = vcmask 326912   ;;  %v345_v6 = vsub.s32 %v342_v51, %v1084_v32  ;;  %s567_s28 = scalar_lea.sflag [#allocation4], %s1018_s23  ;;  %s807_s22 = scalar_lea.vmem %s1127_s11, 1024 }
  0x42   : > { %265 = vadd.xlane.f32.xlu0 %v264_v10  ;;  %268 = vadd.xlane.f32.xlu1 %v267_v11  ;;  %v352_v7 = vsub.s32 %v349_v55, %v1084_v32  ;;  %vm340_vm6 = vcmask 392512   ;;  %vm347_vm7 = vcmask 458112   ;;  %vm354_vm8 = vcmask 523712   ;;  %p808_p6 = scmp.ne.s32.totalorder %s1127_s11, %s807_s22  ;;  %p1185_p11 = scmp.ne.s32.totalorder %s1182_s30, 0 }
  0x43   : > { %713 = vmatpush3.bf16.msra.mxu0 %v712_v22  ;;  %vm435_vm9 = vcmask 1043456   ;;  %vm431_vm10 = vcmask 31744   ;;  %s881_s29 = smov [#allocation5]  }
  0x44   : > { %714 = vmatprep.subr.bf16.mxu0 %v878_v19  ;;  %704 = vmatpush3.msk.msra.mxu1 %vm435_vm9, %v429_v23  ;;  %p809_p12 = pnand %p808_p6, %p1185_p11  ;;  %s811_s12 = sshll.u32 %s881_s29, 4  ;;  %s812_s12 = int_to_ptr.vmem [resolvable:$false] %s811_s12 }
  0x45   : > { %s813_s14 = scalar_lea.vmem %s812_s12, 2048  ;;  %p814_p8 = scmp.lt.s32.totalorder %s1127_s11, %s812_s12 }
  0x46   : > { %271 = vadd.xlane.f32.xlu0 %v270_v14  ;;  %274 = vadd.xlane.f32.xlu1 %v273_v15  ;;  %p810_p13 = pneg %p809_p12  ;;  %p815_p10 = scmp.lt.s32.totalorder %s813_s14, %s807_s22 }
  0x47   : > { %716 = vmatpush3.bf16.msra.mxu0 %v715_v25 }
  0x48   : > { %717 = vmatprep.subr.bf16.mxu0 %v878_v19  ;;  %p816_p0 = por %p815_p10, %p814_p8 }
  0x4a   : > { %p817_p2 = pnand %p816_p0, %p810_p13 }
  0x4b   : > { %719 = vmatpush3.bf16.msra.mxu0 %v718_v28 }
  0xc7   : > { %v254_v35 = vpop.xlane.xlu0 %253  ;;  %v260_v37 = vpop.xlane.xlu1 %259 }
  0xc8   : > { %v276_v40 = vmul.f32 0.015625, %v254_v35  ;;  %v278_v44 = vmul.f32 0.015625, %v260_v37  ;;  %v517_v37 = vsub.s32 0, %v1084_v32 }
  0xca   : > { %v306_v52 = vrot.slane %v276_v40, %v305_v39  ;;  %v318_v56 = vrot.slane %v278_v44, %v317_v43 }
  0xcb   : > { %v257_v45 = vpop.xlane.xlu0 %256  ;;  %v263_v46 = vpop.xlane.xlu1 %262 }
  0xcc   : > { %v277_v48 = vmul.f32 0.015625, %v257_v45  ;;  %v279_v49 = vmul.f32 0.015625, %v263_v46 }
  0xce   : > { %v311_v53 = vrot.slane %v277_v48, %v310_v41  ;;  %v325_v54 = vrot.slane %v279_v49, %v324_v42 }
  0xcf   : > { %v266_v57 = vpop.xlane.xlu0 %265  ;;  %v269_v59 = vpop.xlane.xlu1 %268 }
  0xd0   : > { %v313_v60 = vsel %vm312_vm2, %v311_v53, %v306_v52  ;;  %v280_v61 = vmul.f32 0.015625, %v266_v57  ;;  %v281_v62 = vmul.f32 0.015625, %v269_v59 }
  0xd1   : > { %v320_v63 = vsel %vm319_vm3, %v318_v56, %v313_v60 }
  0xd2   : > { %v327_v3 = vsel %vm326_vm4, %v325_v54, %v320_v63  ;;  %v332_v4 = vrot.slane %v280_v61, %v331_v50  ;;  %v339_v10 = vrot.slane %v281_v62, %v338_v58 }
  0xd3   : > { %v272_v11 = vpop.xlane.xlu0 %271  ;;  %v275_v14 = vpop.xlane.xlu1 %274 }
  0xd4   : > { %v334_v15 = vsel %vm333_vm5, %v332_v4, %v327_v3  ;;  %v282_v16 = vmul.f32 0.015625, %v272_v11  ;;  %v283_v17 = vmul.f32 0.015625, %v275_v14 }
  0xd5   : > { %v341_v20 = vsel %vm340_vm6, %v339_v10, %v334_v15 }
  0xd6   : > { %v346_v18 = vrot.slane %v282_v16, %v345_v6  ;;  %v353_v19 = vrot.slane %v283_v17, %v352_v7 }
  0xd8   : > { %v348_v21 = vsel %vm347_vm7, %v346_v18, %v341_v20 }
  0xd9   : > { %v355_v22 = vsel %vm354_vm8, %v353_v19, %v348_v21 }
  0xda   : > { %701 = vmatmul.mubr.msk.f32.vlgmr.msra.gmra.mrb[0].mxu0 %vm251_vm0, %v355_v22 }
 0x1ad   : > { %v424_v25 = vpop.f32.mrb[0].mxu0 }
 0x1ae   : > { %v425_v26 = vadd.f32 %v424_v25, %v292_v24  ;;  %v702_v27 = vpop.f32.mrb[1].mxu0 }
 0x1b0   : > { %v428_v28 = vmax.f32 %v425_v26, 0.0 }
 0x1b2   : > { %706 = vmatmul.mubr.msk.f32.vlgmr.msra.gmra.mrb[0].mxu1 %vm431_vm10, %v428_v28 }
 0x285   : > { %v505_v30 = vpop.f32.mrb[0].mxu1 }
 0x286   : > { %v506_v31 = vadd.f32 %v505_v30, %v430_v29  ;;  %v707_v33 = vpop.f32.mrb[1].mxu1 }
 0x288   : > { %v665_v34 = vmul.f32 -1.442695, %v506_v31 }
 0x28a   : > { %773 = vpow2.f32 %v665_v34 }
 0x294   : > { %v774_v35 = vpop.eup %773 }
 0x295   : > { %v512_v36 = vadd.f32 1.0, %v774_v35 }
 0x297   : > { %775 = vrcp.f32 %v512_v36 }
 0x2a1   : > { %v776_v38 = vpop.eup %775 }
 0x2a2   : > { %v518_v39 = vrot.slane %v776_v38, %v517_v37 }
 0x2a4   : > { %524 = vbcast.lane.b32.xlu1 %v518_v39, 264  ;;  %520 = vbcast.lane.b32.xlu0 %v518_v39, 256 }
 0x2a8   : > { %528 = vbcast.lane.b32.xlu1 %v518_v39, 272  ;;  %536 = vbcast.lane.b32.xlu0 %v518_v39, 288 }
 0x2ac   : > { %532 = vbcast.lane.b32.xlu1 %v518_v39, 280  ;;  %544 = vbcast.lane.b32.xlu0 %v518_v39, 304 }
 0x2b0   : > { %540 = vbcast.lane.b32.xlu1 %v518_v39, 296 }
 0x2b4   : > { %548 = vbcast.lane.b32.xlu1 %v518_v39, 312 }
 0x316   : > { %v525_v40 = vpop.permute.xlu1 %524  ;;  %v521_v41 = vpop.permute.xlu0 %520 }
 0x317   : > { %v551_v42 = vmul.f32 %v525_v40, %v1032_v2  ;;  %v550_v43 = vmul.f32 %v521_v41, %v1028_v0 }
 0x319   : > { %559 = vst.msk [vmem:[%s242_s10 + $0x8] sm:$0xff] %vm251_vm0, %v551_v42  ;;  %558 = vst.msk [vmem:[%s242_s10] sm:$0xff] %vm251_vm0, %v550_v43 }
 0x31a   : > { %v529_v32 = vpop.permute.xlu1 %528  ;;  %v537_v44 = vpop.permute.xlu0 %536 }
 0x31b   : > { %v552_v45 = vmul.f32 %v529_v32, %v1030_v1  ;;  %v554_v46 = vmul.f32 %v537_v44, %v1044_v8 }
 0x31d   : > { %560 = vst.msk [vmem:[%s242_s10 + $0x10] sm:$0xff] %vm251_vm0, %v552_v45  ;;  %562 = vst.msk [vmem:[%s242_s10 + $0x20] sm:$0xff] %vm251_vm0, %v554_v46 }
 0x31e   : > { %v533_v2 = vpop.permute.xlu1 %532  ;;  %v545_v0 = vpop.permute.xlu0 %544 }
 0x31f   : > { %v553_v47 = vmul.f32 %v533_v2, %v1038_v5  ;;  %v556_v48 = vmul.f32 %v545_v0, %v1052_v12 }
 0x321   : > { %561 = vst.msk [vmem:[%s242_s10 + $0x18] sm:$0xff] %vm251_vm0, %v553_v47  ;;  %564 = vst.msk [vmem:[%s242_s10 + $0x30] sm:$0xff] %vm251_vm0, %v556_v48 }
 0x322   : > { %v541_v49 = vpop.permute.xlu1 %540 }
 0x323   : > { %v555_v1 = vmul.f32 %v541_v49, %v1046_v9 }
 0x325   : > { %563 = vst.msk [vmem:[%s242_s10 + $0x28] sm:$0xff] %vm251_vm0, %v555_v1 }
 0x326   : > { %v549_v8 = vpop.permute.xlu1 %548 }
 0x327   : > { %v557_v5 = vmul.f32 %v549_v8, %v1054_v13 }
 0x329   : > { %565 = vst.msk [vmem:[%s242_s10 + $0x38] sm:$0xff] %vm251_vm0, %v557_v5 }
 0x32a   : > { %820 = shalt.err (!%p817_p2)
}
 0x32b   : > { %s821_s15 = scalar_lea.hbm %s1125_s26, 1024  ;;  %s825_s7 = scalar_lea.hbm %s1178_s5, 2048 }
 0x32c   : > { %p822_p4 = scmp.ne.s32.totalorder %s1125_s26, %s821_s15  ;;  %p826_p9 = scmp.lt.u32.totalorder %s1125_s26, %s1178_s5 }
 0x32d   : > { %p827_p1 = scmp.lt.u32.totalorder %s825_s7, %s821_s15  ;;  %p829_p6 = scmp.lt.u32.totalorder %s821_s15, %s1125_s26 }
 0x32e   : > { %p823_p5 = pnand %p822_p4, %p1185_p11 }
 0x32f   : > { %p828_p3 = por %p827_p1, %p826_p9 }
 0x330   : > { %p824_p7 = pneg %p823_p5 }
 0x331   : > { %p830_p12 = por %p829_p6, %p828_p3 }
 0x333   : > { %p831_p13 = pnand %p830_p12, %p824_p7 }
 0x335   : > { %834 = shalt.err (!%p831_p13)
}
 0x336   : > { %s882_s25 = smov 128   ;;  %s883_s13 = smov 8  }
 0x337   : > { %722 = dma.vmem_to_hbm [thread:$0]  (%p1185_p11), %s1127_s11, 1024, %s1125_s26, %s567_s28, %s882_s25, %s882_s25, %s883_s13  }
 0x338 PF: > { %s595_s17 = sand.u32 1, %s861_s18   ;;  %p1186_p8 = scmp.ne.s32.totalorder %s1183_s6, 0 }
 0x339   : > { %p1187_p10 = scmp.ge.s32.totalorder %s873_s21, 2  ;;  %s596_s22 = scalar_lea.sflag [#allocation4], %s595_s17 }
 0x33b   : > { %p729_p0 = pnand %p1187_p10, %p1186_p8 }
 0x33d   : > { %856 = dma.done.wait (!%p729_p0), %s596_s22, 1024  }
 0x33e   : > { %858 = vsyncadd (!%p729_p0), %s596_s22, 4294966272  ;;  %p18_p2 = scmp.ge.s32.totalorder %s939_s24, 4   ;;  %s1188_s18 = smov %s865_s19 }
 0x33f   : > { %s1189_s19 = smov %s869_s20  ;;  %s1190_s20 = smov %s951_s27 }
 0x340   : > { %s1191_s21 = smov %s939_s24  ;;  %20 = sbr.rel (!%p18_p2) target bundleno = 5 (0x5), region = 85 }
 0x347   :  { %601 = vsyncpa [#allocation3], 1 }
 0x348   :  { %603 = vsyncpa [#allocation3 + $0x1], 1 }
 0x349   :  { %604 = vsyncpa [#allocation4], 1 }
 0x34a   :  { %606 = vsyncpa [#allocation4 + $0x1], 1 }

</bundles_post_ra>
